<compile_context>
chip_gen: v6e
topology: v6e:2x2x1
jax: 0.10.0
libtpu: 0.0.40
codegen_flags: <defaults>
</compile_context>

<pallas_src>
import functools

import jax
import jax.numpy as jnp
import numpy as np
from jax.experimental import pallas as pl
from jax.experimental.pallas import tpu as pltpu

# Matmul operand dtype. float32 keeps the result within ~1e-6 of the f32 reference;
# switch to jnp.bfloat16 for native-rate MXU + half the operand bytes at real ResNet
# sizes (then loosen the test tolerance to ~1e-2).
MXU_DTYPE = jnp.float32

_SUBLANE = 8


def _ceil_to(x, m):
    return (x + m - 1) // m * m


def _pack_weight(w_hwio, cin_p, cout_p):
    """(KH,KW,Cin,Cout) HWIO -> (Cout_p, KH*KW*Cin_p) matching the im2col row order."""
    kh, kw, ci, co = w_hwio.shape
    w = jnp.zeros((kh, kw, cin_p, cout_p), jnp.float32)
    w = w.at[:, :, :ci, :co].set(w_hwio.astype(jnp.float32))
    w = jnp.transpose(w, (3, 0, 1, 2)).reshape(cout_p, kh * kw * cin_p)
    return w.astype(MXU_DTYPE)


# ----------------------------------------------------------------------------
# Fused residual-block kernel (one grid step per batch element).
# ----------------------------------------------------------------------------
def _residual_block_kernel(x_ref, w1_ref, w2_ref, *rest,
                           stride, H1, W1, Wp, Wp2, L1, L2, Lpad1,
                           cin_p, cout_p, lead, has_conv_shortcut):
    if has_conv_shortcut:
        wsc_ref, bn_ref, mask_ref, o_ref = rest
    else:
        bn_ref, mask_ref, o_ref = rest

    KH = KW = 3
    xpf = x_ref[0]                    # (cin_p, Lin)  f32 flat zero-padded image
    bn = bn_ref[...]                  # (cout_p, 8)   folded BN scale/bias columns
    mask = mask_ref[...]              # (1, Lpad1|L1) validity mask for conv1 output

    def im2col(src, pitch, base, length, s):
        """Stack the KH*KW shifted (strided) taps along sublanes -> (KH*KW*C, length)."""
        c = src.shape[0]
        pieces = []
        for kh in range(KH):
            for kw in range(KW):
                off = base + kh * pitch + kw
                if s == 1:
                    p = jax.lax.slice(src, (0, off), (c, off + length))
                else:
                    p = jax.lax.slice(src, (0, off),
                                      (c, off + s * (length - 1) + 1), (1, s))
                pieces.append(p)
        return jnp.concatenate(pieces, axis=0).astype(MXU_DTYPE)

    # ---- conv1 (3x3, stride) + BN + ReLU ---------------------------------------------
    # For stride==1 the result is produced directly in conv2's zero-padded flat layout
    # (row pitch Wp2): border / junk lanes are zeroed by the precomputed mask.
    if stride == 1:
        p1 = im2col(xpf, Wp, 0, Lpad1, 1)                            # (9*cin_p, Lpad1)
        acc1 = jnp.dot(w1_ref[...], p1, preferred_element_type=jnp.float32)
        out1_pad = jnp.maximum(acc1 * bn[:, 0:1] + bn[:, 1:2], 0.0) * mask
    else:
        # TODO(synk): generic-stride path repacks via in-kernel reshape/pad (slower).
        p1 = im2col(xpf, Wp, lead, L1, stride)                       # (9*cin_p, L1)
        acc1 = jnp.dot(w1_ref[...], p1, preferred_element_type=jnp.float32)
        out1 = jnp.maximum(acc1 * bn[:, 0:1] + bn[:, 1:2], 0.0) * mask
        y = out1.reshape(cout_p, H1, Wp)[:, :, :W1]
        y = jnp.pad(y, ((0, 0), (1, 1), (1, 1))).reshape(cout_p, (H1 + 2) * Wp2)
        out1_pad = jnp.pad(y, ((0, 0), (0, KW - 1)))                 # (cout_p, Lpad1)

    # ---- conv2 (3x3, stride 1) + BN ----------------------------------------------------
    p2 = im2col(out1_pad, Wp2, 0, L2, 1)                             # (9*cout_p, L2)
    out2 = jnp.dot(w2_ref[...], p2, preferred_element_type=jnp.float32)
    out2 = out2 * bn[:, 2:3] + bn[:, 3:4]

    # ---- shortcut ----------------------------------------------------------------------
    sc_off = 2 * Wp + 2
    if has_conv_shortcut:
        if stride == 1:
            psc = jax.lax.slice(xpf, (0, sc_off), (cin_p, sc_off + L2)).astype(MXU_DTYPE)
            sc = jnp.dot(wsc_ref[...], psc, preferred_element_type=jnp.float32)
        else:
            psc = jax.lax.slice(xpf, (0, sc_off),
                                (cin_p, sc_off + stride * (L1 - 1) + 1),
                                (1, stride)).astype(MXU_DTYPE)
            sc = jnp.dot(wsc_ref[...], psc, preferred_element_type=jnp.float32)
            sc = sc.reshape(cout_p, H1, Wp)[:, :, :W1]
            sc = jnp.pad(sc, ((0, 0), (0, 0), (0, Wp2 - W1))).reshape(cout_p, L2)
        sc = sc * bn[:, 4:5] + bn[:, 5:6]
    else:
        # identity shortcut (stride==1 and Cin==Cout); residual stays full f32
        sc = jax.lax.slice(xpf, (0, sc_off), (cin_p, sc_off + L2))

    # ---- residual add + final ReLU -----------------------------------------------------
    o_ref[0] = jnp.maximum(out2 + sc, 0.0).astype(o_ref.dtype)


# ----------------------------------------------------------------------------
# Wrapper: layout prep (NCHW kept, spatial flattened onto lanes) + pallas_call.
# ----------------------------------------------------------------------------
def residual_block_forward(x_nchw, params, has_shortcut, stride):
    N, Cin, H, W = x_nchw.shape
    Cout = params["w1"].shape[-1]
    KH = KW = 3
    pad = 1
    Hp, Wp = H + 2 * pad, W + 2 * pad
    H1 = (H + 2 * pad - KH) // stride + 1
    W1 = (W + 2 * pad - KW) // stride + 1
    Wp2 = W1 + 2
    L1 = H1 * Wp                              # conv1 "wide" length (pitch Wp)
    L2 = H1 * Wp2                             # conv2 / output "wide" length (pitch Wp2)
    Lpad1 = (H1 + 2) * Wp2 + (KW - 1)         # conv2 input (zero-bordered) flat length
    lead = Wp + 1                             # leading zeros in the flat input buffer
    cin_p = _ceil_to(Cin, _SUBLANE)
    cout_p = _ceil_to(Cout, _SUBLANE)

    if stride == 1:
        assert Wp2 == Wp
        Lin = max((KH - 1) * Wp + (KW - 1) + Lpad1, lead + Hp * Wp)
    else:
        Lin = max(lead + (KH - 1) * Wp + (KW - 1) + stride * (L1 - 1) + 1,
                  lead + Hp * Wp)

    # Flat, zero-padded input directly in NCHW (no NHWC transpose needed).
    # TODO(synk): padding is materialized once in HBM by XLA; for large activations
    # fold it into the kernel's DMA instead.
    xp = jnp.pad(x_nchw.astype(jnp.float32), ((0, 0), (0, 0), (pad, pad), (pad, pad)))
    x_flat = xp.reshape(N, Cin, Hp * Wp)
    x_flat = jnp.pad(x_flat, ((0, 0), (0, cin_p - Cin), (lead, Lin - lead - Hp * Wp)))

    w1_2d = _pack_weight(params["w1"], cin_p, cout_p)      # (cout_p, 9*cin_p)
    w2_2d = _pack_weight(params["w2"], cout_p, cout_p)     # (cout_p, 9*cout_p)

    # Folded BN params packed into a single (cout_p, 8) f32 tile:
    # columns [s1, b1, s2, b2, s_sc, b_sc, 0, 0]
    s1, b1 = params["bn1"]
    s2, b2 = params["bn2"]
    bn_cols = [s1, b1, s2, b2]
    if has_shortcut:
        ssc, bsc = params["bn_sc"]
        bn_cols += [ssc, bsc]
    bn = jnp.zeros((cout_p, 8), jnp.float32)
    bn = bn.at[:Cout, :len(bn_cols)].set(jnp.stack(bn_cols, axis=1).astype(jnp.float32))

    # Validity mask for conv1's wide output (zeros the padded border / junk lanes).
    if stride == 1:
        q = np.arange(Lpad1)
        r, c = q // Wp2, q % Wp2
        valid = (r >= 1) & (r <= H1) & (c >= 1) & (c <= W1)
    else:
        q = np.arange(L1)
        valid = (q % Wp) < W1
    mask = jnp.asarray(valid.astype(np.float32)[None, :])

    kernel = functools.partial(
        _residual_block_kernel, stride=stride, H1=H1, W1=W1, Wp=Wp, Wp2=Wp2,
        L1=L1, L2=L2, Lpad1=Lpad1, cin_p=cin_p, cout_p=cout_p, lead=lead,
        has_conv_shortcut=has_shortcut)

    in_specs = [
        pl.BlockSpec((1, cin_p, Lin), lambda n: (n, 0, 0)),
        pl.BlockSpec(w1_2d.shape, lambda n: (0, 0)),
        pl.BlockSpec(w2_2d.shape, lambda n: (0, 0)),
    ]
    args = [x_flat, w1_2d, w2_2d]
    if has_shortcut:
        wsc_2d = _pack_weight(params["w_sc"], cin_p, cout_p)   # (cout_p, cin_p)
        in_specs.append(pl.BlockSpec(wsc_2d.shape, lambda n: (0, 0)))
        args.append(wsc_2d)
    in_specs += [pl.BlockSpec(bn.shape, lambda n: (0, 0)),
                 pl.BlockSpec(mask.shape, lambda n: (0, 0))]
    args += [bn, mask]

    out_wide = pl.pallas_call(
        kernel,
        out_shape=jax.ShapeDtypeStruct((N, cout_p, L2), jnp.float32),
        grid=(N,),
        in_specs=in_specs,
        out_specs=pl.BlockSpec((1, cout_p, L2), lambda n: (n, 0, 0)),
        compiler_params=pltpu.CompilerParams(dimension_semantics=("parallel",)),
    )(*args)

    # (N, cout_p, H1*Wp2) -> NCHW (N, Cout, H1, W1): drop pad channels / junk columns.
    return out_wide.reshape(N, cout_p, H1, Wp2)[:, :Cout, :, :W1]


# ----------------------------------------------------------------------------
# Parameters (folded inference BatchNorm) and pure-JAX reference.
# ----------------------------------------------------------------------------
def fold_bn(gamma, beta, mean, var, eps=1e-5):
    scale = gamma / jnp.sqrt(var + eps)
    return scale, beta - mean * scale


def make_params(key, inchannel, outchannel, stride):
    keys = jax.random.split(key, 12)

    def bn(k):
        k0, k1, k2, k3 = jax.random.split(k, 4)
        gamma = 1.0 + 0.1 * jax.random.normal(k0, (outchannel,), jnp.float32)
        beta = 0.1 * jax.random.normal(k1, (outchannel,), jnp.float32)
        mean = 0.1 * jax.random.normal(k2, (outchannel,), jnp.float32)
        var = 1.0 + 0.1 * jnp.abs(jax.random.normal(k3, (outchannel,), jnp.float32))
        return fold_bn(gamma, beta, mean, var)

    p = {
        "w1": 0.1 * jax.random.normal(keys[0], (3, 3, inchannel, outchannel), jnp.float32),
        "w2": 0.1 * jax.random.normal(keys[1], (3, 3, outchannel, outchannel), jnp.float32),
        "bn1": bn(keys[2]),
        "bn2": bn(keys[3]),
    }
    has_shortcut = (stride != 1) or (inchannel != outchannel)
    if has_shortcut:
        p["w_sc"] = 0.1 * jax.random.normal(keys[4], (1, 1, inchannel, outchannel), jnp.float32)
        p["bn_sc"] = bn(keys[5])
    return p, has_shortcut


def _ref_conv_bn(x, w, scale, bias, stride, pad):
    y = jax.lax.conv_general_dilated(
        x, w, window_strides=(stride, stride),
        padding=((pad, pad), (pad, pad)),
        dimension_numbers=("NHWC", "HWIO", "NHWC"),
        precision=jax.lax.Precision.HIGHEST)
    return y * scale + bias


def residual_block_ref(x_nchw, params, has_shortcut, stride):
    x = jnp.transpose(x_nchw, (0, 2, 3, 1))
    s1, b1 = params["bn1"]
    s2, b2 = params["bn2"]
    out = jax.nn.relu(_ref_conv_bn(x, params["w1"], s1, b1, stride, 1))
    out = _ref_conv_bn(out, params["w2"], s2, b2, 1, 1)
    if has_shortcut:
        ssc, bsc = params["bn_sc"]
        sc = _ref_conv_bn(x, params["w_sc"], ssc, bsc, stride, 0)
    else:
        sc = x
    out = jax.nn.relu(out + sc)
    return jnp.transpose(out, (0, 3, 1, 2))


if __name__ == "__main__":
    key = jax.random.PRNGKey(0)
    k_x, k_p = jax.random.split(key)

    N, Cin, H, W = 2, 4, 16, 16
    Cout, stride = 8, 1                     # Cin != Cout -> conv1x1+BN shortcut path

    x = jax.random.normal(k_x, (N, Cin, H, W), jnp.float32)
    params, has_shortcut = make_params(k_p, Cin, Cout, stride)

    out = jax.block_until_ready(residual_block_forward(x, params, has_shortcut, stride))
    ref = jax.block_until_ready(residual_block_ref(x, params, has_shortcut, stride))

    assert out.shape == (N, Cout, H // stride, W // stride), out.shape
    err = float(np.max(np.abs(np.asarray(out) - np.asarray(ref))))
    assert np.allclose(np.asarray(out), np.asarray(ref), atol=5e-4, rtol=5e-4), err

    print("KERNEL_OK")
</pallas_src>

<mosaic_0001>
module attributes {stable_mosaic.version = 11 : i64} {
  func.func @_residual_block_kernel(%arg0: i32, %arg1: memref<1x8x364xf32, #tpu.memory_space<vmem>>, %arg2: memref<8x72xf32, #tpu.memory_space<vmem>>, %arg3: memref<8x72xf32, #tpu.memory_space<vmem>>, %arg4: memref<8x8xf32, #tpu.memory_space<vmem>>, %arg5: memref<8x8xf32, #tpu.memory_space<vmem>>, %arg6: memref<1x326xf32, #tpu.memory_space<vmem>>, %arg7: memref<1x8x288xf32, #tpu.memory_space<vmem>>) attributes {dimension_semantics = [#tpu.dimension_semantics<parallel>], iteration_bounds = array<i64: 2>, scalar_prefetch = 0 : i64, scratch_operands = 0 : i64, tpu.core_type = #tpu.core_type<tc>, window_params = [{transform_indices = @transform_0, window_bounds = array<i64: 1, 8, 364>}, {pipeline_mode = #tpu.pipeline_mode<synchronous>, transform_indices = @transform_1, window_bounds = array<i64: 8, 72>}, {pipeline_mode = #tpu.pipeline_mode<synchronous>, transform_indices = @transform_2, window_bounds = array<i64: 8, 72>}, {pipeline_mode = #tpu.pipeline_mode<synchronous>, transform_indices = @transform_3, window_bounds = array<i64: 8, 8>}, {pipeline_mode = #tpu.pipeline_mode<synchronous>, transform_indices = @transform_4, window_bounds = array<i64: 8, 8>}, {pipeline_mode = #tpu.pipeline_mode<synchronous>, transform_indices = @transform_5, window_bounds = array<i64: 1, 326>}, {transform_indices = @transform_6, window_bounds = array<i64: 1, 8, 288>}]} {
    %c0 = arith.constant 0 : index
    %c0_0 = arith.constant 0 : index
    %c0_1 = arith.constant 0 : index
    %0 = vector.load %arg1[%c0, %c0_0, %c0_1] : memref<1x8x364xf32, #tpu.memory_space<vmem>>, vector<1x8x364xf32>
    %1 = vector.shape_cast %0 : vector<1x8x364xf32> to vector<8x364xf32>
    %c0_2 = arith.constant 0 : index
    %c0_3 = arith.constant 0 : index
    %2 = vector.load %arg5[%c0_2, %c0_3] : memref<8x8xf32, #tpu.memory_space<vmem>>, vector<8x8xf32>
    %c0_4 = arith.constant 0 : index
    %c0_5 = arith.constant 0 : index
    %3 = vector.load %arg6[%c0_4, %c0_5] : memref<1x326xf32, #tpu.memory_space<vmem>>, vector<1x326xf32>
    %4 = vector.extract_strided_slice %1 {offsets = [0, 0], sizes = [8, 326], strides = [1, 1]} : vector<8x364xf32> to vector<8x326xf32>
    %5 = vector.extract_strided_slice %1 {offsets = [0, 1], sizes = [8, 326], strides = [1, 1]} : vector<8x364xf32> to vector<8x326xf32>
    %6 = vector.extract_strided_slice %1 {offsets = [0, 2], sizes = [8, 326], strides = [1, 1]} : vector<8x364xf32> to vector<8x326xf32>
    %7 = vector.extract_strided_slice %1 {offsets = [0, 18], sizes = [8, 326], strides = [1, 1]} : vector<8x364xf32> to vector<8x326xf32>
    %8 = vector.extract_strided_slice %1 {offsets = [0, 19], sizes = [8, 326], strides = [1, 1]} : vector<8x364xf32> to vector<8x326xf32>
    %9 = vector.extract_strided_slice %1 {offsets = [0, 20], sizes = [8, 326], strides = [1, 1]} : vector<8x364xf32> to vector<8x326xf32>
    %10 = vector.extract_strided_slice %1 {offsets = [0, 36], sizes = [8, 326], strides = [1, 1]} : vector<8x364xf32> to vector<8x326xf32>
    %11 = vector.extract_strided_slice %1 {offsets = [0, 37], sizes = [8, 326], strides = [1, 1]} : vector<8x364xf32> to vector<8x326xf32>
    %12 = vector.extract_strided_slice %1 {offsets = [0, 38], sizes = [8, 326], strides = [1, 1]} : vector<8x364xf32> to vector<8x326xf32>
    %13 = tpu.concatenate %4, %5, %6, %7, %8, %9, %10, %11, %12 in 0 : vector<8x326xf32>, vector<8x326xf32>, vector<8x326xf32>, vector<8x326xf32>, vector<8x326xf32>, vector<8x326xf32>, vector<8x326xf32>, vector<8x326xf32>, vector<8x326xf32> -> vector<72x326xf32>
    %c0_6 = arith.constant 0 : index
    %c0_7 = arith.constant 0 : index
    %14 = vector.load %arg2[%c0_6, %c0_7] : memref<8x72xf32, #tpu.memory_space<vmem>>, vector<8x72xf32>
    %cst = arith.constant dense<0.000000e+00> : vector<8x326xf32>
    %15 = tpu.matmul %14, %13, %cst {dimension_numbers = #tpu.dot_dimension_numbers<[1], [0], [0], [1], [0, 0, 1, 1], [], []>} : vector<8x72xf32>, vector<72x326xf32>, vector<8x326xf32> -> vector<8x326xf32>
    %16 = vector.extract_strided_slice %2 {offsets = [0, 0], sizes = [8, 1], strides = [1, 1]} : vector<8x8xf32> to vector<8x1xf32>
    %17 = vector.broadcast %16 : vector<8x1xf32> to vector<8x326xf32>
    %18 = arith.mulf %15, %17 : vector<8x326xf32>
    %19 = vector.extract_strided_slice %2 {offsets = [0, 1], sizes = [8, 1], strides = [1, 1]} : vector<8x8xf32> to vector<8x1xf32>
    %20 = vector.broadcast %19 : vector<8x1xf32> to vector<8x326xf32>
    %21 = arith.addf %18, %20 : vector<8x326xf32>
    %cst_8 = arith.constant 0.000000e+00 : f32
    %22 = vector.broadcast %cst_8 : f32 to vector<8x326xf32>
    %23 = arith.maximumf %21, %22 : vector<8x326xf32>
    %24 = vector.broadcast %3 : vector<1x326xf32> to vector<8x326xf32>
    %25 = arith.mulf %23, %24 : vector<8x326xf32>
    %26 = vector.extract_strided_slice %25 {offsets = [0, 0], sizes = [8, 288], strides = [1, 1]} : vector<8x326xf32> to vector<8x288xf32>
    %27 = vector.extract_strided_slice %25 {offsets = [0, 1], sizes = [8, 288], strides = [1, 1]} : vector<8x326xf32> to vector<8x288xf32>
    %28 = vector.extract_strided_slice %25 {offsets = [0, 2], sizes = [8, 288], strides = [1, 1]} : vector<8x326xf32> to vector<8x288xf32>
    %29 = vector.extract_strided_slice %25 {offsets = [0, 18], sizes = [8, 288], strides = [1, 1]} : vector<8x326xf32> to vector<8x288xf32>
    %30 = vector.extract_strided_slice %25 {offsets = [0, 19], sizes = [8, 288], strides = [1, 1]} : vector<8x326xf32> to vector<8x288xf32>
    %31 = vector.extract_strided_slice %25 {offsets = [0, 20], sizes = [8, 288], strides = [1, 1]} : vector<8x326xf32> to vector<8x288xf32>
    %32 = vector.extract_strided_slice %25 {offsets = [0, 36], sizes = [8, 288], strides = [1, 1]} : vector<8x326xf32> to vector<8x288xf32>
    %33 = vector.extract_strided_slice %25 {offsets = [0, 37], sizes = [8, 288], strides = [1, 1]} : vector<8x326xf32> to vector<8x288xf32>
    %34 = vector.extract_strided_slice %25 {offsets = [0, 38], sizes = [8, 288], strides = [1, 1]} : vector<8x326xf32> to vector<8x288xf32>
    %35 = tpu.concatenate %26, %27, %28, %29, %30, %31, %32, %33, %34 in 0 : vector<8x288xf32>, vector<8x288xf32>, vector<8x288xf32>, vector<8x288xf32>, vector<8x288xf32>, vector<8x288xf32>, vector<8x288xf32>, vector<8x288xf32>, vector<8x288xf32> -> vector<72x288xf32>
    %c0_9 = arith.constant 0 : index
    %c0_10 = arith.constant 0 : index
    %36 = vector.load %arg3[%c0_9, %c0_10] : memref<8x72xf32, #tpu.memory_space<vmem>>, vector<8x72xf32>
    %cst_11 = arith.constant dense<0.000000e+00> : vector<8x288xf32>
    %37 = tpu.matmul %36, %35, %cst_11 {dimension_numbers = #tpu.dot_dimension_numbers<[1], [0], [0], [1], [0, 0, 1, 1], [], []>} : vector<8x72xf32>, vector<72x288xf32>, vector<8x288xf32> -> vector<8x288xf32>
    %38 = vector.extract_strided_slice %2 {offsets = [0, 2], sizes = [8, 1], strides = [1, 1]} : vector<8x8xf32> to vector<8x1xf32>
    %39 = vector.broadcast %38 : vector<8x1xf32> to vector<8x288xf32>
    %40 = arith.mulf %37, %39 : vector<8x288xf32>
    %41 = vector.extract_strided_slice %2 {offsets = [0, 3], sizes = [8, 1], strides = [1, 1]} : vector<8x8xf32> to vector<8x1xf32>
    %42 = vector.broadcast %41 : vector<8x1xf32> to vector<8x288xf32>
    %43 = arith.addf %40, %42 : vector<8x288xf32>
    %44 = vector.extract_strided_slice %1 {offsets = [0, 38], sizes = [8, 288], strides = [1, 1]} : vector<8x364xf32> to vector<8x288xf32>
    %c0_12 = arith.constant 0 : index
    %c0_13 = arith.constant 0 : index
    %45 = vector.load %arg4[%c0_12, %c0_13] : memref<8x8xf32, #tpu.memory_space<vmem>>, vector<8x8xf32>
    %cst_14 = arith.constant dense<0.000000e+00> : vector<8x288xf32>
    %46 = tpu.matmul %45, %44, %cst_14 {dimension_numbers = #tpu.dot_dimension_numbers<[1], [0], [0], [1], [0, 0, 1, 1], [], []>} : vector<8x8xf32>, vector<8x288xf32>, vector<8x288xf32> -> vector<8x288xf32>
    %47 = vector.extract_strided_slice %2 {offsets = [0, 4], sizes = [8, 1], strides = [1, 1]} : vector<8x8xf32> to vector<8x1xf32>
    %48 = vector.broadcast %47 : vector<8x1xf32> to vector<8x288xf32>
    %49 = arith.mulf %46, %48 : vector<8x288xf32>
    %50 = vector.extract_strided_slice %2 {offsets = [0, 5], sizes = [8, 1], strides = [1, 1]} : vector<8x8xf32> to vector<8x1xf32>
    %51 = vector.broadcast %50 : vector<8x1xf32> to vector<8x288xf32>
    %52 = arith.addf %49, %51 : vector<8x288xf32>
    %53 = arith.addf %43, %52 : vector<8x288xf32>
    %cst_15 = arith.constant 0.000000e+00 : f32
    %54 = vector.broadcast %cst_15 : f32 to vector<8x288xf32>
    %55 = arith.maximumf %53, %54 : vector<8x288xf32>
    %c0_16 = arith.constant 0 : index
    %c0_17 = arith.constant 0 : index
    %c0_18 = arith.constant 0 : index
    %56 = vector.load %arg7[%c0_16, %c0_17, %c0_18] : memref<1x8x288xf32, #tpu.memory_space<vmem>>, vector<1x8x288xf32>
    %57 = vector.shape_cast %56 : vector<1x8x288xf32> to vector<8x288xf32>
    %58 = vector.shape_cast %55 : vector<8x288xf32> to vector<1x8x288xf32>
    tpu.vector_store %arg7[%c0_16, %c0_17, %c0_18], %58 {strides = array<i32>} : memref<1x8x288xf32, #tpu.memory_space<vmem>>, vector<1x8x288xf32>,
    return
  }
  func.func @transform_0(%arg0: i32) -> (i32, i32, i32) {
    %c0_i32 = arith.constant 0 : i32
    %c0_i32_0 = arith.constant 0 : i32
    %c0_i32_1 = arith.constant 0 : i32
    return %arg0, %c0_i32, %c0_i32_0 : i32, i32, i32
  }
  func.func @transform_1(%arg0: i32) -> (i32, i32) {
    %c0_i32 = arith.constant 0 : i32
    %c0_i32_0 = arith.constant 0 : i32
    %c0_i32_1 = arith.constant 0 : i32
    return %c0_i32, %c0_i32_0 : i32, i32
  }
  func.func @transform_2(%arg0: i32) -> (i32, i32) {
    %c0_i32 = arith.constant 0 : i32
    %c0_i32_0 = arith.constant 0 : i32
    %c0_i32_1 = arith.constant 0 : i32
    return %c0_i32, %c0_i32_0 : i32, i32
  }
  func.func @transform_3(%arg0: i32) -> (i32, i32) {
    %c0_i32 = arith.constant 0 : i32
    %c0_i32_0 = arith.constant 0 : i32
    %c0_i32_1 = arith.constant 0 : i32
    return %c0_i32, %c0_i32_0 : i32, i32
  }
  func.func @transform_4(%arg0: i32) -> (i32, i32) {
    %c0_i32 = arith.constant 0 : i32
    %c0_i32_0 = arith.constant 0 : i32
    %c0_i32_1 = arith.constant 0 : i32
    return %c0_i32, %c0_i32_0 : i32, i32
  }
  func.func @transform_5(%arg0: i32) -> (i32, i32) {
    %c0_i32 = arith.constant 0 : i32
    %c0_i32_0 = arith.constant 0 : i32
    %c0_i32_1 = arith.constant 0 : i32
    return %c0_i32, %c0_i32_0 : i32, i32
  }
  func.func @transform_6(%arg0: i32) -> (i32, i32, i32) {
    %c0_i32 = arith.constant 0 : i32
    %c0_i32_0 = arith.constant 0 : i32
    %c0_i32_1 = arith.constant 0 : i32
    return %arg0, %c0_i32, %c0_i32_0 : i32, i32, i32
  }
}

</mosaic_0001>

<bundles_post_ra>
// kernel: tpu_custom_call.1
= control target key start
LH: loop header
LB: loop body
LE: loop exit
PB: predicated region body
PF: predicated region fallthrough
CT: control target
= control target key end

     0   :  { %s2015_s0 = inlined_call_operand.hbm [shape: f32[2,8,364], index: 0, kind: input, shape index: {}]   ;;  %s2016_s1 = inlined_call_operand.hbm [shape: f32[8,72], index: 1, kind: input, shape index: {}]   ;;  %s2017_s2 = inlined_call_operand.hbm [shape: f32[8,72], index: 2, kind: input, shape index: {}]   ;;  %s2018_s3 = inlined_call_operand.hbm [shape: f32[8,8], index: 3, kind: input, shape index: {}]   ;;  %s2019_s4 = inlined_call_operand.hbm [shape: f32[8,8], index: 4, kind: input, shape index: {}]   ;;  %s2020_s5 = inlined_call_operand.vmem [shape: f32[1,326], index: 5, kind: input, shape index: {}]   ;;  %s2021_s6 = inlined_call_operand.hbm [shape: f32[2,8,288], index: 6, kind: output, shape index: {}]  }
   0x1   :  { %2026 = sst [smem:[#allocation16_spill]] %s2016_s1 }
   0x2   :  { %11 = vsyncpa [#allocation3], 0 }
   0x3   :  { %13 = vsyncpa [#allocation3 + $0x1], 0 }
   0x4   :  { %14 = vsyncpa [#allocation6], 0 }
   0x5   :  { %15 = vsyncpa [#allocation9], 0 }
   0x6   :  { %16 = vsyncpa [#allocation4], 0 }
   0x7   :  { %18 = vsyncpa [#allocation4 + $0x1], 0  ;;  %s1616_s21 = smov 0   ;;  %s1618_s22 = smov 0  }
   0x8   :  { %s1620_s23 = smov 0   ;;  %s1622_s24 = smov 0  }
   0x9 LB: > { %s1559_s25 = smov [#allocation5]   ;;  %s1637_s27 = sadd.s32 4294967295, %s1557_s24   ;;  %s1557_s24 = sphi %s1622_s24, %s2047_s24   ;;  %s1553_s23 = sphi %s1620_s23, %s2046_s23   ;;  %s1549_s22 = sphi %s1618_s22, %s2045_s22   ;;  %s1545_s21 = sphi %s1616_s21, %s2044_s21  }
   0xa   : > { %s199_s26 = sshll.u32 %s1559_s25, 4  ;;  %p1149_p0 = scmp.ge.s32.totalorder %s1557_s24, 1  ;;  %s200_s26 = int_to_ptr.vmem [resolvable:$true] %s199_s26 }
   0xb   : > { %p2022_p1 = scmp.eq.s32.totalorder %s1637_s27, 0  ;;  %p186_p2 = scmp.lt.s32.totalorder %s1557_s24, 3 }
   0xc   : > { %s1560_s29 = smov [#allocation8]   ;;  %s1561_s7 = smov [#allocation7]  }
   0xd   : > { %p1642_p3 = pnand %p1149_p0, %p186_p2  ;;  %s221_s30 = sshll.u32 %s1560_s29, 4  ;;  %s222_s30 = int_to_ptr.vmem [resolvable:$true] %s221_s30 }
   0xe   : > { %s210_s8 = sshll.u32 %s1561_s7, 4  ;;  %s1562_s10 = smov [#allocation10]   ;;  %s1655_s8 = int_to_ptr.vmem [resolvable:$true] %s210_s8 }
   0xf   : > { %s2027_s28 = scalar_select %p1642_p3, 1, 0 }
  0x10   : > { %p1263_p5 = pneg %p1642_p3  ;;  %s1657_s11 = sshll.u32 %s1562_s10, 4  ;;  %s233_s11 = int_to_ptr.vmem [resolvable:$true] %s1657_s11 }
  0x11   : > { %s1364_s12 = scalar_lea.vmem %s200_s26, 128  ;;  %p1372_p11 = scmp.lt.s32.totalorder %s200_s26, %s200_s26 }
  0x12   : > { %p1651_p6 = pnand %p1263_p5, %p2022_p1  ;;  %p1365_p8 = scmp.ne.s32.totalorder %s200_s26, %s1364_s12 }
  0x13   : > { %p1373_p12 = scmp.lt.s32.totalorder %s1364_s12, %s1364_s12 }
  0x14   : > { %p1355_p7 = pneg %p1651_p6 }
  0x15   : > { %p1374_p13 = por %p1373_p12, %p1372_p11 }
  0x16   : > { %p1367_p9 = pnand %p1365_p8, %p1355_p7 }
  0x18   : > { %p1368_p10 = pneg %p1367_p9 }
  0x1a   : > { %p1375_p0 = pnand %p1374_p13, %p1368_p10 }
  0x1c   : > { %1378 = shalt.err (!%p1375_p0)
}
  0x1d   : > { %s2029_s1 = sld [smem:[#allocation16_spill]]  ;;  %s1390_s15 = scalar_lea.vmem %s222_s30, 128 }
  0x1e   : > { %p1391_p2 = scmp.ne.s32.totalorder %s222_s30, %s1390_s15  ;;  %p1398_p8 = scmp.lt.s32.totalorder %s222_s30, %s222_s30 }
  0x1f   : > { %p1399_p9 = scmp.lt.s32.totalorder %s1390_s15, %s1390_s15 }
  0x20   : > { %p1393_p5 = pnand %p1391_p2, %p1355_p7 }
  0x21   : > { %p1400_p1 = por %p1399_p9, %p1398_p8 }
  0x22   : > { %p1394_p4 = pneg %p1393_p5 }
  0x23   : > { %1266 = dma.hbm_to_vmem [thread:$0]  (!%p1651_p6), %s2029_s1, 128, %s200_s26, [#allocation6]  }
  0x24   : > { %p1401_p3 = pnand %p1400_p1, %p1394_p4 }
  0x26   : > { %1404 = shalt.err (!%p1401_p3)
}
  0x27   : > { %1272 = dma.hbm_to_vmem [thread:$0]  (!%p1651_p6), %s2018_s3, 128, %s222_s30, [#allocation9]  }
  0x28   : > { %s1416_s18 = scalar_lea.vmem %s1655_s8, 128  ;;  %p1424_p13 = scmp.lt.s32.totalorder %s1655_s8, %s1655_s8 }
  0x29   : > { %p1417_p10 = scmp.ne.s32.totalorder %s1655_s8, %s1416_s18  ;;  %p1425_p1 = scmp.lt.s32.totalorder %s1416_s18, %s1416_s18 }
  0x2b   : > { %p1419_p11 = pnand %p1417_p10, %p1355_p7  ;;  %p1426_p3 = por %p1425_p1, %p1424_p13 }
  0x2d   : > { %p1420_p12 = pneg %p1419_p11 }
  0x2f   : > { %p1427_p4 = pnand %p1426_p3, %p1420_p12 }
  0x31   : > { %1430 = shalt.err (!%p1427_p4)
}
  0x32   : > { %1269 = dma.hbm_to_vmem [thread:$0]  (!%p1651_p6), %s2017_s2, 128, %s1655_s8, [#allocation6]  }
  0x33   : > { %s1442_s25 = scalar_lea.vmem %s233_s11, 128  ;;  %p1450_p8 = scmp.lt.s32.totalorder %s233_s11, %s233_s11 }
  0x34   : > { %p1443_p0 = scmp.ne.s32.totalorder %s233_s11, %s1442_s25  ;;  %p1451_p9 = scmp.lt.s32.totalorder %s1442_s25, %s1442_s25 }
  0x36   : > { %p1445_p2 = pnand %p1443_p0, %p1355_p7  ;;  %p1452_p10 = por %p1451_p9, %p1450_p8 }
  0x38   : > { %p1446_p5 = pneg %p1445_p2 }
  0x3a   : > { %p1453_p11 = pnand %p1452_p10, %p1446_p5 }
  0x3c   : > { %1456 = shalt.err (!%p1453_p11)
}
  0x3d   : > { %1275 = dma.hbm_to_vmem [thread:$0]  (!%p1651_p6), %s2019_s4, 128, %s233_s11, [#allocation9]  }
  0x3e   : > { %s1148_s30 = sadd.s32 4294967294, %s1557_s24   ;;  %s1701_s7 = sadd.s32 1, %s1557_s24  }
  0x3f   : > { %s28_s8 = ssub.s32 %s1557_s24, %s1701_s7  ;;  %s31_s9 = sadd.s32 1, %s1553_s23 }
  0x40   : > { %p29_p7 = scmp.eq.s32.totalorder %s28_s8, 0  ;;  %p38_p12 = scmp.ne.s32.totalorder %s1553_s23, %s1549_s22 }
  0x41   : > { %p39_p13 = scmp.eq.s32.totalorder %s1557_s24, 0  ;;  %p44_p1 = scmp.ne.s32.totalorder %s1549_s22, %s1545_s21 }
  0x42   : > { %s1712_s10 = scalar_select %p29_p7, %s1553_s23, %s31_s9  }
  0x43   : > { %p40_p3 = por %p39_p13, %p38_p12  ;;  %p2030_p4 = scmp.eq.s32.totalorder %s1637_s27, 0 }
  0x44   : > { %p173_p6 = scmp.eq.s32.totalorder %s1637_s27, 1  ;;  %p179_p2 = scmp.eq.s32.totalorder %s1148_s30, 1 }
  0x45   : > { %p1716_p0 = por %p2030_p4, %p44_p1  ;;  %p1288_p5 = scmp.lt.s32.totalorder %s1557_s24, 2 }
  0x46   : > { %s246_s11 = sand.u32 1, %s1553_s23   ;;  %p1723_p8 = por %p173_p6, %p38_p12 }
  0x47   : > { %s2031_s12 = scalar_select %p1716_p0, 1, 0 }
  0x48   : > { %s2032_s13 = scalar_select %p1723_p8, 1, 0 }
  0x49   : > { %p1727_p9 = por %p179_p2, %p44_p1  ;;  %s1239_s15 = smul.u32 24, %s246_s11 }
  0x4a   : > { %s1240_s16 = smul.u32 384, %s1557_s24  ;;  %p1732_p10 = pnand %p1288_p5, %p40_p3 }
  0x4b   : > { %s2033_s14 = scalar_select %p1727_p9, 1, 0 }
  0x4c   : > { %s1739_s20 = scalar_lea.hbm %s2015_s0, %s1240_s16  ;;  %s250_s25 = scalar_lea.vmem [#allocation2], %s1239_s15 }
  0x4d   : > { %s258_s26 = sshll.u32 %s250_s25, 4  ;;  %s247_s29 = scalar_lea.sflag [#allocation3], %s246_s11  ;;  %s259_s26 = int_to_ptr.vmem [resolvable:$true] %s258_s26 }
  0x4e   : > { %s1457_s30 = scalar_lea.hbm %s1739_s20, 384  ;;  %p1459_p7 = pneg %p1732_p10 }
  0x4f   : > { %p1458_p11 = scmp.ne.s32.totalorder %s1739_s20, %s1457_s30  ;;  %s1462_s18 = scalar_lea.hbm %s2015_s0, 768 }
  0x50   : > { %p1463_p1 = scmp.lt.s32.totalorder %s1739_s20, %s2015_s0  ;;  %p1464_p3 = scmp.lt.s32.totalorder %s1462_s18, %s1457_s30 }
  0x51   : > { %p1460_p12 = pnand %p1459_p7, %p1458_p11 }
  0x52   : > { %p1465_p4 = por %p1464_p3, %p1463_p1 }
  0x53   : > { %p1461_p13 = pneg %p1460_p12 }
  0x55   : > { %p1466_p6 = pnand %p1465_p4, %p1461_p13 }
  0x57   : > { %1469 = shalt.err (!%p1466_p6)
}
  0x58   : > { %s1470_s15 = scalar_lea.vmem %s259_s26, 384  ;;  %s1563_s11 = smov [#allocation2]  }
  0x59   : > { %p1471_p2 = scmp.ne.s32.totalorder %s259_s26, %s1470_s15  ;;  %s1475_s25 = sshll.u32 %s1563_s11, 4  ;;  %s1476_s25 = int_to_ptr.vmem [resolvable:$false] %s1475_s25 }
  0x5a   : > { %s1477_s1 = scalar_lea.vmem %s1476_s25, 768  ;;  %p1478_p11 = scmp.lt.s32.totalorder %s259_s26, %s1476_s25 }
  0x5b   : > { %p1473_p5 = pnand %p1471_p2, %p1459_p7  ;;  %p1479_p12 = scmp.lt.s32.totalorder %s1477_s1, %s1470_s15 }
  0x5d   : > { %p1474_p9 = pneg %p1473_p5  ;;  %p1480_p8 = por %p1479_p12, %p1478_p11 }
  0x5f   : > { %p1481_p0 = pnand %p1480_p8, %p1474_p9 }
  0x61   : > { %1484 = shalt.err (!%p1481_p0)
}
  0x62   : > { %1279 = dma.hbm_to_vmem [thread:$0]  (!%p1732_p10), %s1739_s20, 384, %s259_s26, %s247_s29  }
  0x63   : > { %p2035_p13 = scmp.ne.s32.totalorder %s2027_s28, 0 }
  0x64   : > { %s1758_s30 = sand.u32 (!%p2035_p13), 1, %s1549_s22   ;;  %p2036_p8 = scmp.ne.s32.totalorder (!%p2035_p13), %s2031_s12, 0 }
  0x65   : > { %267 = sbr.rel (%p2035_p13) target bundleno = 862 (0x35e), region = 44  ;;  %s270_s9 = scalar_lea.sflag (!%p2035_p13), [#allocation3], %s1758_s30 }
  0x66   : > { %s1241_s8 = smul.u32 (!%p2035_p13), 24, %s1758_s30 }
  0x68   : > { %s273_s1 = scalar_lea.vmem (!%p2035_p13), [#allocation2], %s1241_s8 }
  0x6a   : > { %1528 = dma.done.wait (%p2036_p8), %s270_s9, 384  }
  0x6b   : > { %1530 = vsyncadd (%p2036_p8), %s270_s9, 4294966912  ;;  %p2037_p0 = scmp.eq.s32.totalorder %s1637_s27, 0 }
  0x6d   : > { %1532 = dma.done.wait (%p2037_p0), [#allocation6], 256   ;;  %p2038_p9 = pmov %p2037_p0 }
  0x6e   : > { %p2039_p10 = pmov %p2037_p0 }
  0x6f   : > { %1534 = vsyncadd (%p2038_p9), [#allocation6], 4294967040 }
  0x70   : > { %1536 = dma.done.wait (%p2039_p10), [#allocation9], 256   ;;  %p2040_p7 = pmov %p2037_p0 }
  0x71   : > { %v1564_v0 = vmov 0.0   ;;  %v1778_v1 = vld [vmem:[%s273_s1 + $0x8] sm:$0xff]  ;;  %v1780_v2 = vld [vmem:[%s273_s1] sm:$0xff]  ;;  %s1565_s28 = smov 90   ;;  %v1786_v3 = vld [vmem:[%s273_s1 + $0x10] sm:$0xff]  ;;  %s1566_s12 = smov 91   ;;  %v587_v48 = vlaneseq }
  0x72   : > { %1538 = vsyncadd (%p2040_p7), [#allocation9], 4294967040  ;;  %1192 = vmatprep.subr.mxu1 %v1564_v0  ;;  %491 = vmatprep.mubr.f32.mxu0 %v1564_v0  ;;  %s1567_s17 = smov 92   ;;  %s1568_s20 = smov 108   ;;  %vm1571_vm0 = vmmov 0   ;;  %v1573_v4 = vmov 0  }
  0x73   : > { %412 = vrot.lane.b32.xlu0 %v1778_v1, %s1565_s28  ;;  %410 = vrot.lane.b32.xlu1 %v1780_v2, %s1565_s28  ;;  %s1569_s26 = smov 109   ;;  %s1570_s29 = smov 110   ;;  %v1574_v5 = vmov 1   ;;  %v1834_v6 = vld [vmem:[#allocation10] sm:$0xff]  ;;  %vm416_vm1 = vcmask 736256   ;;  %vm404_vm2 = vcmask 744448  }
  0x74   : > { %1210 = vmatprep.mubr.msk.f32.mxu1 %vm1571_vm0, %v1564_v0  ;;  %s1572_s18 = smov 126   ;;  %1346 = vset.pattern.permute.xlu0 %v1573_v4  ;;  %s1575_s19 = smov 127   ;;  %vm392_vm3 = vcmask 752640   ;;  %vm380_vm4 = vcmask 883712   ;;  %vm368_vm5 = vcmask 891904   ;;  %vm356_vm6 = vcmask 900096  }
  0x75   : > { %1347 = vset.pattern.permute.xlu1 %v1574_v5  ;;  %vm344_vm7 = vcmask 1031168   ;;  %vm332_vm8 = vcmask 1039360   ;;  %v422_v47 = vld [vmem:[#allocation5] sm:$0xff]  ;;  %vm423_vm9 = vcmask 588800   ;;  %v588_v49 = vshrl.u32 %v587_v48, 7  ;;  %s1242_s11 = smul.u32 384, %s1637_s27 }
  0x76   : > { %v322_v53 = vld [vmem:[%s2020_s5] sm:$0x7]  ;;  %vm856_vm10 = vcmask 64512   ;;  %vm1023_vm11 = vcmask 261120   ;;  %s317_s25 = scalar_lea.vmem [#allocation11], %s1241_s8  ;;  %p2041_p3 = scmp.ne.s32.totalorder %s2032_s13, 0 }
  0x77   : > { %414 = vrot.lane.b32.xlu0 %v1786_v3, %s1565_s28  ;;  %400 = vrot.lane.b32.xlu1 %v1778_v1, %s1566_s12  ;;  %v597_v51 = vsub.s32 2, %v588_v49  ;;  %v589_v63 = vsub.s32 0, %v588_v49  ;;  %s1040_s9 = sshll.u32 %s317_s25, 4  ;;  %s1580_s27 = smov [#allocation11]   ;;  %s1041_s9 = int_to_ptr.vmem [resolvable:$true] %s1040_s9 }
  0x78   : > { %s1489_s8 = sshll.u32 %s1580_s27, 4  ;;  %s1490_s8 = int_to_ptr.vmem [resolvable:$false] %s1489_s8 }
  0x79   : > { %v598_v57 = vrot.slane %v322_v53, %v597_v51  ;;  %p1492_p2 = scmp.lt.s32.totalorder %s1041_s9, %s1490_s8 }
  0x7b   : > { %402 = vrot.lane.b32.xlu0 %v1786_v3, %s1566_s12  ;;  %398 = vrot.lane.b32.xlu1 %v1780_v2, %s1566_s12 }
  0x7f   : > { %388 = vrot.lane.b32.xlu0 %v1778_v1, %s1567_s17  ;;  %390 = vrot.lane.b32.xlu1 %v1786_v3, %s1567_s17 }
  0x83   : > { %386 = vrot.lane.b32.xlu0 %v1780_v2, %s1567_s17  ;;  %376 = vrot.lane.b32.xlu1 %v1778_v1, %s1568_s20 }
  0x87   : > { %378 = vrot.lane.b32.xlu0 %v1786_v3, %s1568_s20  ;;  %374 = vrot.lane.b32.xlu1 %v1780_v2, %s1568_s20 }
  0x8b   : > { %364 = vrot.lane.b32.xlu0 %v1778_v1, %s1569_s26  ;;  %366 = vrot.lane.b32.xlu1 %v1786_v3, %s1569_s26 }
  0x8f   : > { %362 = vrot.lane.b32.xlu0 %v1780_v2, %s1569_s26  ;;  %352 = vrot.lane.b32.xlu1 %v1778_v1, %s1570_s29 }
  0x93   : > { %354 = vrot.lane.b32.xlu0 %v1786_v3, %s1570_s29  ;;  %350 = vrot.lane.b32.xlu1 %v1780_v2, %s1570_s29 }
  0x97   : > { %340 = vrot.lane.b32.xlu0 %v1778_v1, %s1572_s18  ;;  %342 = vrot.lane.b32.xlu1 %v1786_v3, %s1572_s18 }
  0x9b   : > { %338 = vrot.lane.b32.xlu0 %v1780_v2, %s1572_s18  ;;  %328 = vrot.lane.b32.xlu1 %v1778_v1, %s1575_s19 }
  0x9f   : > { %330 = vrot.lane.b32.xlu0 %v1786_v3, %s1575_s19  ;;  %326 = vrot.lane.b32.xlu1 %v1780_v2, %s1575_s19 }
  0xa3   : > { %570 = vperm.xlu0 %1346, %v1834_v6   ;;  %577 = vperm.xlu1 %1347, %v1834_v6  }
  0xe5   : > { %v413_v7 = vpop.permute.xlu0 %412  ;;  %v411_v8 = vpop.permute.xlu1 %410 }
  0xe6   : > { %v1847_v12 = vsel %vm416_vm1, %v411_v8, %v413_v7 }
  0xe9   : > { %v1838_v9 = vpop.permute.xlu0 %414  ;;  %v401_v10 = vpop.permute.xlu1 %400 }
  0xea   : > { %1193 = vmatpush3.msra.mxu1 %v1838_v9  ;;  %v1843_v11 = vsel %vm416_vm1, %v413_v7, %v1838_v9 }
  0xeb   : > { %441 = vmatprep.subr.mxu0 %v1843_v11  ;;  %1194 = vmatprep.subr.mxu1 %v1564_v0 }
  0xec   : > { %442 = vmatpush1.msra.mxu0 %v1847_v12 }
  0xed   : > { %v403_v13 = vpop.permute.xlu0 %402  ;;  %v399_v14 = vpop.permute.xlu1 %398 }
  0xee   : > { %1195 = vmatpush3.msra.mxu1 %v403_v13  ;;  %v406_v15 = vsel %vm404_vm2, %v401_v10, %v403_v13  ;;  %v405_v16 = vsel %vm404_vm2, %v399_v14, %v401_v10  ;;  %v593_v10 = vsub.s32 1, %v588_v49 }
  0xef   : > { %443 = vmatprep.subr.mxu0 %v406_v15  ;;  %1196 = vmatprep.subr.mxu1 %v1564_v0 }
  0xf0   : > { %444 = vmatpush1.msra.mxu0 %v405_v16  ;;  %v594_v14 = vrot.slane %v322_v53, %v593_v10  ;;  %v1576_v16 = vmov 2  }
  0xf1   : > { %v389_v17 = vpop.permute.xlu0 %388  ;;  %v391_v18 = vpop.permute.xlu1 %390  ;;  %1348 = vset.pattern.permute.xlu1 %v1576_v16 }
  0xf2   : > { %v394_v19 = vsel %vm392_vm3, %v389_v17, %v391_v18  ;;  %1197 = vmatpush3.msra.mxu1 %v391_v18  ;;  %v1578_v18 = vmov 3  }
  0xf3   : > { %445 = vmatprep.subr.mxu0 %v394_v19  ;;  %1198 = vmatprep.subr.mxu1 %v1564_v0  ;;  %v1579_v19 = vmov 5  }
  0xf5   : > { %v387_v20 = vpop.permute.xlu0 %386  ;;  %v377_v21 = vpop.permute.xlu1 %376 }
  0xf6   : > { %v393_v22 = vsel %vm392_vm3, %v387_v20, %v389_v17  ;;  %v1577_v17 = vmov 4  }
  0xf7   : > { %446 = vmatpush1.msra.mxu0 %v393_v22  ;;  %1349 = vset.pattern.permute.xlu0 %v1577_v17 }
  0xf9   : > { %v379_v23 = vpop.permute.xlu0 %378  ;;  %v375_v24 = vpop.permute.xlu1 %374 }
  0xfa   : > { %1199 = vmatpush3.msra.mxu1 %v379_v23  ;;  %v382_v25 = vsel %vm380_vm4, %v377_v21, %v379_v23  ;;  %v381_v26 = vsel %vm380_vm4, %v375_v24, %v377_v21 }
  0xfb   : > { %447 = vmatprep.subr.mxu0 %v382_v25  ;;  %1200 = vmatprep.subr.mxu1 %v1564_v0 }
  0xfc   : > { %448 = vmatpush1.msra.mxu0 %v381_v26 }
  0xfd   : > { %v365_v27 = vpop.permute.xlu0 %364  ;;  %v367_v28 = vpop.permute.xlu1 %366 }
  0xfe   : > { %v370_v29 = vsel %vm368_vm5, %v365_v27, %v367_v28  ;;  %1201 = vmatpush3.msra.mxu1 %v367_v28 }
  0xff   : > { %449 = vmatprep.subr.mxu0 %v370_v29  ;;  %1202 = vmatprep.subr.mxu1 %v1564_v0 }
 0x101   : > { %v363_v30 = vpop.permute.xlu0 %362  ;;  %v353_v31 = vpop.permute.xlu1 %352 }
 0x102   : > { %v369_v32 = vsel %vm368_vm5, %v363_v30, %v365_v27 }
 0x103   : > { %450 = vmatpush1.msra.mxu0 %v369_v32 }
 0x105   : > { %v355_v33 = vpop.permute.xlu0 %354  ;;  %v351_v34 = vpop.permute.xlu1 %350 }
 0x106   : > { %1203 = vmatpush3.msra.mxu1 %v355_v33  ;;  %v358_v35 = vsel %vm356_vm6, %v353_v31, %v355_v33  ;;  %v357_v36 = vsel %vm356_vm6, %v351_v34, %v353_v31 }
 0x107   : > { %451 = vmatprep.subr.mxu0 %v358_v35  ;;  %1204 = vmatprep.subr.mxu1 %v1564_v0 }
 0x108   : > { %452 = vmatpush1.msra.mxu0 %v357_v36 }
 0x109   : > { %v341_v37 = vpop.permute.xlu0 %340  ;;  %v343_v38 = vpop.permute.xlu1 %342 }
 0x10a   : > { %v346_v39 = vsel %vm344_vm7, %v341_v37, %v343_v38  ;;  %1205 = vmatpush3.msra.mxu1 %v343_v38 }
 0x10b   : > { %453 = vmatprep.subr.mxu0 %v346_v39  ;;  %1206 = vmatprep.subr.mxu1 %v1564_v0 }
 0x10d   : > { %v339_v40 = vpop.permute.xlu0 %338  ;;  %v329_v41 = vpop.permute.xlu1 %328 }
 0x10e   : > { %v345_v42 = vsel %vm344_vm7, %v339_v40, %v341_v37 }
 0x10f   : > { %454 = vmatpush1.msra.mxu0 %v345_v42 }
 0x111   : > { %v331_v43 = vpop.permute.xlu0 %330  ;;  %v327_v44 = vpop.permute.xlu1 %326 }
 0x112   : > { %1207 = vmatpush3.msra.mxu1 %v331_v43  ;;  %v334_v45 = vsel %vm332_vm8, %v329_v41, %v331_v43  ;;  %v333_v46 = vsel %vm332_vm8, %v327_v44, %v329_v41 }
 0x113   : > { %455 = vmatprep.subr.mxu0 %v334_v45  ;;  %1208 = vmatprep.subr.mxu1 %v1564_v0 }
 0x114   : > { %456 = vmatpush1.msra.mxu0 %v333_v46  ;;  %1209 = vmatpush3.msra.mxu1 %v1786_v3 }
 0x115   : > { %457 = vmatprep.subr.mxu0 %v1778_v1  ;;  %1211 = vmatmul.mubr.msk.f32.vlgmr.msra.gmra.mxu1 %vm423_vm9, %v422_v47 }
 0x116   : > { %458 = vmatpush1.msra.mxu0 %v1780_v2  ;;  %1213 = vmatprep.subr.mxu1 %v1564_v0  ;;  %v590_v2 = vrot.slane %v322_v53, %v589_v63 }
 0x117   : > { %1161 = vmatmul.mubr.msk.f32.vlgmr.msra.gmra.mxu0 %vm423_vm9, %v422_v47  ;;  %1231 = vmatprep.mubr.msk.f32.mxu1 %vm1571_vm0, %v1564_v0 }
 0x118   : > { %764 = vmatprep.mubr.f32.mxu0 %v1564_v0 }
 0x11e   : > { %v571_v50 = vpop.permute.xlu0 %570  ;;  %v578_v54 = vpop.permute.xlu1 %577 }
 0x1d5   : > { %v564_v52 = vpop.f32.mrf.mxu1 }
 0x1d6   : > { %v575_v55 = vmul.f32 %v571_v50, %v564_v52 }
 0x1d7   : > { %v1212_v56 = vpop.f32.mrf.mxu1  ;;  %v493_v59 = vpop.f32.mrf.mxu0 }
 0x1d8   : > { %v582_v58 = vadd.f32 %v578_v54, %v575_v55  ;;  %v573_v61 = vmul.f32 %v571_v50, %v493_v59  ;;  %v696_v59 = vld [vmem:[#allocation7] sm:$0xff] }
 0x1d9   : > { %v495_v5 = vpop.f32.mrf.mxu0 }
 0x1da   : > { %v585_v60 = vmax.f32 %v582_v58, 0.0  ;;  %v580_v1 = vadd.f32 %v578_v54, %v573_v61  ;;  %v574_v7 = vmul.f32 %v571_v50, %v495_v5 }
 0x1dc   : > { %v1884_v62 = vmul.f32 %v598_v57, %v585_v60  ;;  %v583_v3 = vmax.f32 %v580_v1, 0.0  ;;  %v581_v8 = vadd.f32 %v578_v54, %v574_v7  ;;  %v855_v60 = vld [vmem:[#allocation8] sm:$0xff] }
 0x1de   : > { %678 = vrot.lane.b32.xlu1 %v1884_v62, %s1566_s12  ;;  %689 = vrot.lane.b32.xlu0 %v1884_v62, %s1565_s28  ;;  %v1898_v4 = vmul.f32 %v590_v2, %v583_v3  ;;  %v584_v13 = vmax.f32 %v581_v8, 0.0 }
 0x1e0   : > { %v1916_v15 = vmul.f32 %v594_v14, %v584_v13 }
 0x1e2   : > { %656 = vrot.lane.b32.xlu1 %v1884_v62, %s1568_s20  ;;  %667 = vrot.lane.b32.xlu0 %v1884_v62, %s1567_s17 }
 0x1e6   : > { %634 = vrot.lane.b32.xlu1 %v1884_v62, %s1570_s29  ;;  %645 = vrot.lane.b32.xlu0 %v1884_v62, %s1569_s26 }
 0x1ea   : > { %623 = vrot.lane.b32.xlu0 %v1884_v62, %s1572_s18  ;;  %685 = vrot.lane.b32.xlu1 %v1898_v4, %s1565_s28 }
 0x1ee   : > { %674 = vrot.lane.b32.xlu0 %v1898_v4, %s1566_s12  ;;  %663 = vrot.lane.b32.xlu1 %v1898_v4, %s1567_s17 }
 0x1f2   : > { %652 = vrot.lane.b32.xlu0 %v1898_v4, %s1568_s20  ;;  %641 = vrot.lane.b32.xlu1 %v1898_v4, %s1569_s26 }
 0x1f6   : > { %630 = vrot.lane.b32.xlu0 %v1898_v4, %s1570_s29  ;;  %619 = vrot.lane.b32.xlu1 %v1898_v4, %s1572_s18 }
 0x1fa   : > { %676 = vrot.lane.b32.xlu0 %v1916_v15, %s1566_s12  ;;  %687 = vrot.lane.b32.xlu1 %v1916_v15, %s1565_s28  ;;  %s1038_s12 = scalar_lea.hbm %s2021_s6, %s1242_s11 }
 0x1fe   : > { %654 = vrot.lane.b32.xlu0 %v1916_v15, %s1568_s20  ;;  %665 = vrot.lane.b32.xlu1 %v1916_v15, %s1567_s17  ;;  %s1026_s17 = scalar_lea.sflag [#allocation4], %s1758_s30  ;;  %s1485_s20 = scalar_lea.vmem %s1041_s9, 384 }
 0x1ff   : > { %p1486_p1 = scmp.ne.s32.totalorder %s1041_s9, %s1485_s20 }
 0x201   : > { %p1487_p4 = pnand %p1486_p1, %p2041_p3 }
 0x202   : > { %632 = vrot.lane.b32.xlu0 %v1916_v15, %s1570_s29  ;;  %643 = vrot.lane.b32.xlu1 %v1916_v15, %s1569_s26  ;;  %s1491_s26 = scalar_lea.vmem %s1490_s8, 768 }
 0x203   : > { %p1488_p6 = pneg %p1487_p4  ;;  %p1493_p5 = scmp.lt.s32.totalorder %s1491_s26, %s1485_s20 }
 0x205   : > { %p1494_p11 = por %p1493_p5, %p1492_p2 }
 0x206   : > { %610 = vrot.lane.b32.xlu0 %v1916_v15, %s1575_s19  ;;  %621 = vrot.lane.b32.xlu1 %v1916_v15, %s1572_s18 }
 0x207   : > { %p1495_p12 = pnand %p1494_p11, %p1488_p6 }
 0x20a   : > { %608 = vrot.lane.b32.xlu0 %v1898_v4, %s1575_s19  ;;  %612 = vrot.lane.b32.xlu1 %v1884_v62, %s1575_s19 }
 0x20e   : > { %842 = vperm.xlu1 %1348, %v1834_v6   ;;  %1002 = vperm.xlu0 %1349, %v1834_v6  }
 0x212   : > { %1350 = vset.pattern.permute.xlu1 %v1578_v18  ;;  %1352 = vset.pattern.permute.xlu0 %v1579_v19 }
 0x213   : > { %849 = vperm.xlu1 %1350, %v1834_v6  }
 0x217   : > { %1351 = vset.pattern.permute.xlu1 %v1579_v19 }
 0x218   : > { %1009 = vperm.xlu1 %1351, %v1834_v6  }
 0x250   : > { %v679_v20 = vpop.permute.xlu1 %678  ;;  %v690_v21 = vpop.permute.xlu0 %689 }
 0x251   : > { %1214 = vmatpush3.msra.mxu1 %v690_v21 }
 0x252   : > { %1215 = vmatprep.subr.mxu1 %v1564_v0 }
 0x253   : > { %1216 = vmatpush3.msra.mxu1 %v679_v20 }
 0x254   : > { %v657_v22 = vpop.permute.xlu1 %656  ;;  %1217 = vmatprep.subr.mxu1 %v1564_v0  ;;  %v668_v23 = vpop.permute.xlu0 %667 }
 0x255   : > { %1218 = vmatpush3.msra.mxu1 %v668_v23 }
 0x256   : > { %1219 = vmatprep.subr.mxu1 %v1564_v0 }
 0x257   : > { %1220 = vmatpush3.msra.mxu1 %v657_v22 }
 0x258   : > { %v635_v24 = vpop.permute.xlu1 %634  ;;  %1221 = vmatprep.subr.mxu1 %v1564_v0  ;;  %v646_v25 = vpop.permute.xlu0 %645 }
 0x259   : > { %1222 = vmatpush3.msra.mxu1 %v646_v25 }
 0x25a   : > { %1223 = vmatprep.subr.mxu1 %v1564_v0 }
 0x25b   : > { %1224 = vmatpush3.msra.mxu1 %v635_v24 }
 0x25c   : > { %1225 = vmatprep.subr.mxu1 %v1564_v0  ;;  %v624_v6 = vpop.permute.xlu0 %623  ;;  %v686_v26 = vpop.permute.xlu1 %685 }
 0x25d   : > { %1226 = vmatpush3.msra.mxu1 %v624_v6 }
 0x25e   : > { %1227 = vmatprep.subr.mxu1 %v1564_v0 }
 0x260   : > { %v675_v27 = vpop.permute.xlu0 %674  ;;  %v664_v28 = vpop.permute.xlu1 %663 }
 0x264   : > { %v653_v29 = vpop.permute.xlu0 %652  ;;  %v642_v30 = vpop.permute.xlu1 %641 }
 0x268   : > { %v631_v31 = vpop.permute.xlu0 %630  ;;  %v620_v32 = vpop.permute.xlu1 %619 }
 0x26c   : > { %v677_v33 = vpop.permute.xlu0 %676  ;;  %v688_v34 = vpop.permute.xlu1 %687 }
 0x26d   : > { %v691_v35 = vsel %vm416_vm1, %v686_v26, %v688_v34  ;;  %v692_v36 = vsel %vm416_vm1, %v688_v34, %v690_v21  ;;  %v681_v37 = vsel %vm404_vm2, %v677_v33, %v679_v20  ;;  %v680_v38 = vsel %vm404_vm2, %v675_v27, %v677_v33 }
 0x26e   : > { %714 = vmatprep.subr.mxu0 %v692_v36 }
 0x26f   : > { %715 = vmatpush1.msra.mxu0 %v691_v35 }
 0x270   : > { %v655_v39 = vpop.permute.xlu0 %654  ;;  %716 = vmatprep.subr.mxu0 %v681_v37  ;;  %v666_v40 = vpop.permute.xlu1 %665 }
 0x271   : > { %v669_v41 = vsel %vm392_vm3, %v664_v28, %v666_v40  ;;  %717 = vmatpush1.msra.mxu0 %v680_v38  ;;  %v670_v42 = vsel %vm392_vm3, %v666_v40, %v668_v23  ;;  %v659_v43 = vsel %vm380_vm4, %v655_v39, %v657_v22  ;;  %v658_v44 = vsel %vm380_vm4, %v653_v29, %v655_v39 }
 0x272   : > { %718 = vmatprep.subr.mxu0 %v670_v42 }
 0x273   : > { %719 = vmatpush1.msra.mxu0 %v669_v41 }
 0x274   : > { %v633_v45 = vpop.permute.xlu0 %632  ;;  %720 = vmatprep.subr.mxu0 %v659_v43  ;;  %v644_v46 = vpop.permute.xlu1 %643 }
 0x275   : > { %v647_v47 = vsel %vm368_vm5, %v642_v30, %v644_v46  ;;  %721 = vmatpush1.msra.mxu0 %v658_v44  ;;  %v648_v48 = vsel %vm368_vm5, %v644_v46, %v646_v25  ;;  %v637_v49 = vsel %vm356_vm6, %v633_v45, %v635_v24  ;;  %v636_v50 = vsel %vm356_vm6, %v631_v31, %v633_v45 }
 0x276   : > { %722 = vmatprep.subr.mxu0 %v648_v48 }
 0x277   : > { %723 = vmatpush1.msra.mxu0 %v647_v47 }
 0x278   : > { %v611_v51 = vpop.permute.xlu0 %610  ;;  %724 = vmatprep.subr.mxu0 %v637_v49  ;;  %v622_v52 = vpop.permute.xlu1 %621 }
 0x279   : > { %v625_v53 = vsel %vm344_vm7, %v620_v32, %v622_v52  ;;  %725 = vmatpush1.msra.mxu0 %v636_v50  ;;  %v626_v54 = vsel %vm344_vm7, %v622_v52, %v624_v6 }
 0x27a   : > { %726 = vmatprep.subr.mxu0 %v626_v54 }
 0x27b   : > { %727 = vmatpush1.msra.mxu0 %v625_v53 }
 0x27c   : > { %v609_v55 = vpop.permute.xlu0 %608  ;;  %v613_v56 = vpop.permute.xlu1 %612 }
 0x27d   : > { %v614_v57 = vsel %vm332_vm8, %v609_v55, %v611_v51  ;;  %1228 = vmatpush3.msra.mxu1 %v613_v56  ;;  %v615_v58 = vsel %vm332_vm8, %v611_v51, %v613_v56 }
 0x27e   : > { %728 = vmatprep.subr.mxu0 %v615_v58  ;;  %1229 = vmatprep.subr.mxu1 %v1564_v0 }
 0x27f   : > { %729 = vmatpush1.msra.mxu0 %v614_v57  ;;  %1230 = vmatpush3.msra.mxu1 %v1884_v62 }
 0x280   : > { %730 = vmatprep.subr.mxu0 %v1916_v15  ;;  %1232 = vmatmul.mubr.msk.f32.vlgmr.msra.gmra.mxu1 %vm423_vm9, %v696_v59 }
 0x281   : > { %1234 = vmatprep.subr.mxu1 %v1564_v0  ;;  %731 = vmatpush1.msra.mxu0 %v1898_v4 }
 0x282   : > { %1235 = vmatpush3.msra.mxu1 %v1838_v9  ;;  %1163 = vmatmul.mubr.msk.f32.vlgmr.msra.gmra.mxu0 %vm423_vm9, %v696_v59 }
 0x283   : > { %890 = vmatprep.subr.mxu0 %v1843_v11  ;;  %1236 = vmatprep.mubr.msk.f32.mxu1 %vm1571_vm0, %v1564_v0 }
 0x284   : > { %891 = vmatpush1.msra.mxu0 %v1847_v12  ;;  %1237 = vmatmul.mubr.msk.f32.vlgmr.msra.gmra.mxu1 %vm856_vm10, %v855_v60 }
 0x285   : > { %924 = vmatprep.mubr.f32.mxu0 %v1564_v0 }
 0x286   : > { %1165 = vmatmul.mubr.msk.f32.vlgmr.msra.gmra.mxu0 %vm856_vm10, %v855_v60 }
 0x289   : > { %v843_v61 = vpop.permute.xlu1 %842  ;;  %v1003_v1 = vpop.permute.xlu0 %1002 }
 0x28e   : > { %v850_v62 = vpop.permute.xlu1 %849 }
 0x293   : > { %v1010_v4 = vpop.permute.xlu1 %1009 }
 0x340   : > { %v837_v63 = vpop.f32.mrf.mxu1 }
 0x341   : > { %v847_v9 = vmul.f32 %v843_v61, %v837_v63 }
 0x342   : > { %v766_v2 = vpop.f32.mrf.mxu0  ;;  %v1233_v3 = vpop.f32.mrf.mxu1 }
 0x343   : > { %v845_v11 = vmul.f32 %v843_v61, %v766_v2  ;;  %v854_v12 = vadd.f32 %v850_v62, %v847_v9 }
 0x344   : > { %v768_v5 = vpop.f32.mrf.mxu0  ;;  %v997_v7 = vpop.f32.mrf.mxu1 }
 0x345   : > { %v1007_v8 = vmul.f32 %v1003_v1, %v997_v7  ;;  %v846_v14 = vmul.f32 %v843_v61, %v768_v5  ;;  %v852_v17 = vadd.f32 %v850_v62, %v845_v11 }
 0x346   : > { %v926_v10 = vpop.f32.mrf.mxu0  ;;  %v1238_v13 = vpop.f32.mrf.mxu1 }
 0x347   : > { %v1005_v0 = vmul.f32 %v1003_v1, %v926_v10  ;;  %v1014_v15 = vadd.f32 %v1010_v4, %v1007_v8  ;;  %v853_v21 = vadd.f32 %v850_v62, %v846_v14 }
 0x348   : > { %v928_v16 = vpop.f32.mrf.mxu0 }
 0x349   : > { %v1012_v18 = vadd.f32 %v1010_v4, %v1005_v0  ;;  %v1017_v19 = vadd.f32 %v1014_v15, %v854_v12  ;;  %v1006_v20 = vmul.f32 %v1003_v1, %v928_v16 }
 0x34b   : > { %v1015_v22 = vadd.f32 %v1012_v18, %v852_v17  ;;  %v1020_v23 = vmax.f32 %v1017_v19, 0.0  ;;  %v1013_v24 = vadd.f32 %v1010_v4, %v1006_v20 }
 0x34d   : > { %v1018_v25 = vmax.f32 %v1015_v22, 0.0  ;;  %v1016_v6 = vadd.f32 %v1013_v24, %v853_v21  ;;  %1024 = vst.msk [vmem:[%s317_s25 + $0x10] sm:$0xff] %vm1023_vm11, %v1020_v23 }
 0x34f   : > { %1021 = vst [vmem:[%s317_s25] sm:$0xff] %v1018_v25  ;;  %v1019_v26 = vmax.f32 %v1016_v6, 0.0 }
 0x351   : > { %1022 = vst [vmem:[%s317_s25 + $0x8] sm:$0xff] %v1019_v26 }
 0x352   : > { %1498 = shalt.err (!%p1495_p12)
}
 0x353   : > { %s1499_s29 = scalar_lea.hbm %s1038_s12, 384  ;;  %s1503_s19 = scalar_lea.hbm %s2021_s6, 768 }
 0x354   : > { %p1500_p13 = scmp.ne.s32.totalorder %s1038_s12, %s1499_s29  ;;  %p1504_p9 = scmp.lt.s32.totalorder %s1038_s12, %s2021_s6 }
 0x355   : > { %p1505_p10 = scmp.lt.s32.totalorder %s1503_s19, %s1499_s29 }
 0x356   : > { %p1501_p8 = pnand %p1500_p13, %p2041_p3 }
 0x357   : > { %p1506_p7 = por %p1505_p10, %p1504_p9 }
 0x358   : > { %p1502_p0 = pneg %p1501_p8 }
 0x35a   : > { %p1507_p1 = pnand %p1506_p7, %p1502_p0 }
 0x35c   : > { %1510 = shalt.err (!%p1507_p1)
}
 0x35d   : > { %1261 = dma.vmem_to_hbm [thread:$0]  (%p2041_p3), %s1041_s9, 384, %s1038_s12, %s1026_s17  }
 0x35e PF: > { %s1052_s11 = sand.u32 1, %s1545_s21   ;;  %p2042_p4 = scmp.ne.s32.totalorder %s2033_s14, 0 }
 0x35f   : > { %p2043_p6 = scmp.ge.s32.totalorder %s1557_s24, 2  ;;  %s1053_s25 = scalar_lea.sflag [#allocation4], %s1052_s11 }
 0x361   : > { %p1281_p2 = pnand %p2043_p6, %p2042_p4 }
 0x363   : > { %p1282_p5 = pneg %p1281_p2 }
 0x365   : > { %1540 = dma.done.wait (%p1282_p5), %s1053_s25, 384  }
 0x366   : > { %1542 = vsyncadd (%p1282_p5), %s1053_s25, 4294966912  ;;  %p21_p11 = scmp.ge.s32.totalorder %s1701_s7, 4   ;;  %s2044_s21 = smov %s1549_s22 }
 0x367   : > { %s2045_s22 = smov %s1553_s23  ;;  %s2046_s23 = smov %s1712_s10 }
 0x368   : > { %s2047_s24 = smov %s1701_s7  ;;  %23 = sbr.rel (!%p21_p11) target bundleno = 9 (0x9), region = 105 }
 0x36d   :  { %1058 = vsyncpa [#allocation3], 1 }
 0x36e   :  { %1060 = vsyncpa [#allocation3 + $0x1], 1 }
 0x36f   :  { %1061 = vsyncpa [#allocation6], 1 }
 0x370   :  { %1062 = vsyncpa [#allocation9], 1 }
 0x371   :  { %1063 = vsyncpa [#allocation4], 1 }
 0x372   :  { %1065 = vsyncpa [#allocation4 + $0x1], 1 }

</bundles_post_ra>
